<compile_context>
chip_gen: v7x
topology: tpu7x:2x2x1
jax: 0.10.0
libtpu: 0.0.40
codegen_flags: <defaults>
</compile_context>

<pallas_src>
import functools

import numpy as np
import jax
import jax.numpy as jnp
from jax import lax
from jax.experimental import pallas as pl
from jax.experimental.pallas import tpu as pltpu

LN_EPS = 1e-5
LANES = 128                          # TPU vreg lane width
_TARGET_BLOCK_BYTES = 2 * 1024 * 1024
_VMEM_LIMIT_BYTES = 32 * 1024 * 1024


def _sublane_align(dtype) -> int:
    """Row alignment = packed sublane tile: f32 -> 8, bf16 -> 16, int8/fp8 -> 32."""
    return max(8, 32 // jnp.dtype(dtype).itemsize)


def _pick_block_rows(rows, row_bytes, align, target_bytes=_TARGET_BLOCK_BYTES):
    """Row tile: ~target_bytes per block, >= 4 grid steps when possible (so the
    'parallel' axis gives each of the two TensorCores >= 2 pipelined steps),
    aligned to the dtype's packed sublane tile.  Partial tail blocks are fine."""
    if rows <= align:
        return rows                              # single full-extent block
    tr = max(align, target_bytes // row_bytes)
    tr = min(tr, pl.cdiv(rows, 4))               # keep the megacore grid >= 4 steps
    tr = max(align, (tr // align) * align)
    return min(tr, rows)


# ---------------------------------------------------------------------------
# Kernels
# ---------------------------------------------------------------------------
def _bfln_packed_kernel(x_ref, w_ref, bd_ref, o_ref, *, inv_c, eps):
    """Lane-packed path: x_ref is (TR, 128) where each 128-lane row holds 128//C
    original rows; bd_ref is the constant (128, 128) block-diagonal ones matrix."""
    x = x_ref[...].astype(jnp.float32)
    bd = bd_ref[...]
    # Segmented sums via the MXU: (x @ BD)[r, j] = sum of x[r, :] over the C-lane
    # segment containing lane j, i.e. the segment sum already broadcast across its
    # lanes (f32 accumulate).  Everything else stays on VPU/EUP.
    s1 = jnp.dot(x, bd, preferred_element_type=jnp.float32)       # seg sum(x)
    s2 = jnp.dot(x * x, bd, preferred_element_type=jnp.float32)   # seg sum(x^2)
    mean = s1 * inv_c
    var = jnp.maximum(s2 * inv_c - mean * mean, 0.0)              # one pass, clamped
    inv_std = lax.rsqrt(var + eps)                                # EUP slot
    o_ref[...] = (x * inv_std * w_ref[...]).astype(o_ref.dtype)


def _bfln_rowwise_kernel(x_ref, w_ref, o_ref, *, inv_c, eps):
    """Fallback (unpacked) path: one normalized row per block row."""
    x = x_ref[...].astype(jnp.float32)                            # (TR, C)
    mean = jnp.sum(x, axis=-1, keepdims=True) * inv_c
    xc = x - mean
    var = jnp.sum(xc * xc, axis=-1, keepdims=True) * inv_c        # biased variance
    inv_std = lax.rsqrt(var + eps)
    o_ref[...] = (x * inv_std * w_ref[...]).astype(o_ref.dtype)


# ---------------------------------------------------------------------------
# Wrapper
# ---------------------------------------------------------------------------
def biasfree_layernorm(x, weight, *, eps=LN_EPS,
                       target_block_bytes=_TARGET_BLOCK_BYTES):
    """x: (..., C), weight: (C,) -> same shape/dtype as x."""
    orig_shape = x.shape
    C = orig_shape[-1]
    assert weight.shape == (C,), (weight.shape, C)
    R = int(np.prod(orig_shape[:-1]))
    itemsize = jnp.dtype(x.dtype).itemsize
    align = _sublane_align(x.dtype)

    # Lane-pack 128//C original rows into one 128-lane row (free reshape of a
    # contiguous array) whenever the shapes allow it.
    pack = (C < LANES) and (LANES % C == 0) and ((R * C) % LANES == 0)

    if pack:
        P = LANES // C
        Rp = (R * C) // LANES
        x2 = x.reshape(Rp, LANES)
        w2 = jnp.tile(weight.astype(jnp.float32).reshape(1, C), (1, P))   # (1, 128)
        seg = np.arange(LANES) // C
        bd = jnp.asarray((seg[:, None] == seg[None, :]).astype(np.float32))  # (128,128)

        TR = _pick_block_rows(Rp, LANES * itemsize, align, target_block_bytes)
        grid = (pl.cdiv(Rp, TR),)
        out = pl.pallas_call(
            functools.partial(_bfln_packed_kernel, inv_c=1.0 / C, eps=eps),
            out_shape=jax.ShapeDtypeStruct((Rp, LANES), x.dtype),
            grid=grid,
            in_specs=[
                pl.BlockSpec((TR, LANES), lambda i: (i, 0)),
                pl.BlockSpec((1, LANES), lambda i: (0, 0)),      # resident weight
                pl.BlockSpec((LANES, LANES), lambda i: (0, 0)),  # resident block-diag
            ],
            out_specs=pl.BlockSpec((TR, LANES), lambda i: (i, 0)),
            compiler_params=pltpu.CompilerParams(
                dimension_semantics=("parallel",),
                vmem_limit_bytes=_VMEM_LIMIT_BYTES),
        )(x2, w2, bd)
    else:
        x2 = x.reshape(R, C)
        w2 = weight.astype(jnp.float32).reshape(1, C)
        TR = _pick_block_rows(R, C * itemsize, align, target_block_bytes)
        grid = (pl.cdiv(R, TR),)
        out = pl.pallas_call(
            functools.partial(_bfln_rowwise_kernel, inv_c=1.0 / C, eps=eps),
            out_shape=jax.ShapeDtypeStruct((R, C), x.dtype),
            grid=grid,
            in_specs=[
                pl.BlockSpec((TR, C), lambda i: (i, 0)),
                pl.BlockSpec((1, C), lambda i: (0, 0)),
            ],
            out_specs=pl.BlockSpec((TR, C), lambda i: (i, 0)),
            compiler_params=pltpu.CompilerParams(
                dimension_semantics=("parallel",),
                vmem_limit_bytes=_VMEM_LIMIT_BYTES),
        )(x2, w2)
    return out.reshape(orig_shape)


# ---------------------------------------------------------------------------
# Pure-JAX reference (mirrors the PyTorch module exactly)
# ---------------------------------------------------------------------------
def biasfree_layernorm_ref(x, weight, eps=LN_EPS):
    xf = x.astype(jnp.float32)
    var = jnp.var(xf, axis=-1, keepdims=True)          # biased (ddof=0)
    y = xf / jnp.sqrt(var + eps) * weight.astype(jnp.float32)
    return y.astype(x.dtype)


if __name__ == "__main__":
    key = jax.random.PRNGKey(0)
    k1, k2, k3, k4, k5, k6, kw, kw2 = jax.random.split(key, 8)

    C = 32
    weight = 1.0 + 0.1 * jax.random.normal(kw, (C,), jnp.float32)

    tests = []
    # Integer-valued f32 inputs: the segmented-sum matmuls are then exact under any
    # MXU f32 emulation, so these check formula / segmentation / weight handling at
    # tight tolerance.  Shapes cover 3-D token layout, 4-D input, and a partial
    # tail row-block.
    x_a = jnp.round(3.0 * jax.random.normal(k1, (2, 16 * 16, C), jnp.float32))
    x_b = jnp.round(3.0 * jax.random.normal(k2, (2, 8, 16, C), jnp.float32))
    x_c = jnp.round(3.0 * jax.random.normal(k3, (3, 300, C), jnp.float32))
    tests += [(x_a, weight, 1e-4), (x_b, weight, 1e-4), (x_c, weight, 1e-4)]

    # Continuous-valued sanity check (tolerance allows reduced-precision MXU passes
    # for the f32 segmented sums; real formula bugs are O(0.1) or larger).
    x_d = 2.0 * jax.random.normal(k4, (2, 256, C), jnp.float32) + 0.5
    tests.append((x_d, weight, 1e-2))

    # bf16 input: exercises the 16-row sublane alignment; bf16 output rounding
    # dominates the error budget.
    x_e = jax.random.normal(k5, (2, 256, C), jnp.float32).astype(jnp.bfloat16)
    tests.append((x_e, weight, 1e-1))

    # Channel count that does not divide 128 -> row-wise fallback path.
    C2 = 48
    weight2 = 1.0 + 0.1 * jax.random.normal(kw2, (C2,), jnp.float32)
    x_f = jax.random.normal(k6, (2, 64, C2), jnp.float32)
    tests.append((x_f, weight2, 1e-4))

    for x, w, tol in tests:
        out = jax.block_until_ready(biasfree_layernorm(x, w))
        ref = biasfree_layernorm_ref(x, w)
        assert out.shape == x.shape and out.dtype == x.dtype, (out.shape, out.dtype)
        assert bool(jnp.all(jnp.isfinite(out.astype(jnp.float32))))
        err = float(jnp.max(jnp.abs(out.astype(jnp.float32) - ref.astype(jnp.float32))))
        assert err < tol, (tuple(x.shape), str(x.dtype), err, tol)

    print("KERNEL_OK")
</pallas_src>

<mosaic_0001>
module attributes {stable_mosaic.version = 11 : i64} {
  func.func @_bfln_packed_kernel(%arg0: i32, %arg1: memref<32x128xf32, #tpu.memory_space<vmem>>, %arg2: memref<1x128xf32, #tpu.memory_space<vmem>>, %arg3: memref<128x128xf32, #tpu.memory_space<vmem>>, %arg4: memref<32x128xf32, #tpu.memory_space<vmem>>) attributes {dimension_semantics = [#tpu.dimension_semantics<parallel>], iteration_bounds = array<i64: 4>, scalar_prefetch = 0 : i64, scratch_operands = 0 : i64, tpu.core_type = #tpu.core_type<tc>, window_params = [{transform_indices = @transform_0, window_bounds = array<i64: 32, 128>}, {pipeline_mode = #tpu.pipeline_mode<synchronous>, transform_indices = @transform_1, window_bounds = array<i64: 1, 128>}, {pipeline_mode = #tpu.pipeline_mode<synchronous>, transform_indices = @transform_2, window_bounds = array<i64: 128, 128>}, {transform_indices = @transform_3, window_bounds = array<i64: 32, 128>}]} {
    %c0 = arith.constant 0 : index
    %c0_0 = arith.constant 0 : index
    %0 = vector.load %arg1[%c0, %c0_0] : memref<32x128xf32, #tpu.memory_space<vmem>>, vector<32x128xf32>
    %c0_1 = arith.constant 0 : index
    %c0_2 = arith.constant 0 : index
    %1 = vector.load %arg3[%c0_1, %c0_2] : memref<128x128xf32, #tpu.memory_space<vmem>>, vector<128x128xf32>
    %cst = arith.constant dense<0.000000e+00> : vector<32x128xf32>
    %2 = tpu.matmul %0, %1, %cst {dimension_numbers = #tpu.dot_dimension_numbers<[1], [0], [0], [1], [0, 0, 1, 1], [], []>} : vector<32x128xf32>, vector<128x128xf32>, vector<32x128xf32> -> vector<32x128xf32>
    %3 = arith.mulf %0, %0 : vector<32x128xf32>
    %cst_3 = arith.constant dense<0.000000e+00> : vector<32x128xf32>
    %4 = tpu.matmul %3, %1, %cst_3 {dimension_numbers = #tpu.dot_dimension_numbers<[1], [0], [0], [1], [0, 0, 1, 1], [], []>} : vector<32x128xf32>, vector<128x128xf32>, vector<32x128xf32> -> vector<32x128xf32>
    %cst_4 = arith.constant 3.125000e-02 : f32
    %5 = vector.broadcast %cst_4 : f32 to vector<32x128xf32>
    %6 = arith.mulf %2, %5 : vector<32x128xf32>
    %cst_5 = arith.constant 3.125000e-02 : f32
    %7 = vector.broadcast %cst_5 : f32 to vector<32x128xf32>
    %8 = arith.mulf %4, %7 : vector<32x128xf32>
    %9 = arith.mulf %6, %6 : vector<32x128xf32>
    %10 = arith.subf %8, %9 : vector<32x128xf32>
    %cst_6 = arith.constant 0.000000e+00 : f32
    %11 = vector.broadcast %cst_6 : f32 to vector<32x128xf32>
    %12 = arith.maximumf %10, %11 : vector<32x128xf32>
    %cst_7 = arith.constant 9.99999974E-6 : f32
    %13 = vector.broadcast %cst_7 : f32 to vector<32x128xf32>
    %14 = arith.addf %12, %13 : vector<32x128xf32>
    %15 = math.rsqrt %14 : vector<32x128xf32>
    %16 = arith.mulf %0, %15 : vector<32x128xf32>
    %c0_8 = arith.constant 0 : index
    %c0_9 = arith.constant 0 : index
    %17 = vector.load %arg2[%c0_8, %c0_9] : memref<1x128xf32, #tpu.memory_space<vmem>>, vector<1x128xf32>
    %18 = vector.broadcast %17 : vector<1x128xf32> to vector<32x128xf32>
    %19 = arith.mulf %16, %18 : vector<32x128xf32>
    %c0_10 = arith.constant 0 : index
    %c0_11 = arith.constant 0 : index
    %20 = vector.load %arg4[%c0_10, %c0_11] : memref<32x128xf32, #tpu.memory_space<vmem>>, vector<32x128xf32>
    tpu.vector_store %arg4[%c0_10, %c0_11], %19 {strides = array<i32>} : memref<32x128xf32, #tpu.memory_space<vmem>>, vector<32x128xf32>,
    return
  }
  func.func @transform_0(%arg0: i32) -> (i32, i32) {
    %c0_i32 = arith.constant 0 : i32
    %c0_i32_0 = arith.constant 0 : i32
    return %arg0, %c0_i32 : i32, i32
  }
  func.func @transform_1(%arg0: i32) -> (i32, i32) {
    %c0_i32 = arith.constant 0 : i32
    %c0_i32_0 = arith.constant 0 : i32
    %c0_i32_1 = arith.constant 0 : i32
    return %c0_i32, %c0_i32_0 : i32, i32
  }
  func.func @transform_2(%arg0: i32) -> (i32, i32) {
    %c0_i32 = arith.constant 0 : i32
    %c0_i32_0 = arith.constant 0 : i32
    %c0_i32_1 = arith.constant 0 : i32
    return %c0_i32, %c0_i32_0 : i32, i32
  }
  func.func @transform_3(%arg0: i32) -> (i32, i32) {
    %c0_i32 = arith.constant 0 : i32
    %c0_i32_0 = arith.constant 0 : i32
    return %arg0, %c0_i32 : i32, i32
  }
}

</mosaic_0001>

<bundles_post_ra>
// kernel: tpu_custom_call.1
= control target key start
LH: loop header
LB: loop body
LE: loop exit
PB: predicated region body
PF: predicated region fallthrough
CT: control target
= control target key end

     0   :  { %8 = vsyncpa [#allocation3], 0  ;;  %s1192_s0 = inlined_call_operand.hbm [shape: f32[128,128], index: 0, kind: input, shape index: {}]   ;;  %s1193_s1 = inlined_call_operand.vmem [shape: f32[1,128], index: 1, kind: input, shape index: {}]   ;;  %s1194_s2 = inlined_call_operand.hbm [shape: f32[128,128], index: 2, kind: input, shape index: {}]   ;;  %s1195_s3 = inlined_call_operand.hbm [shape: f32[128,128], index: 3, kind: output, shape index: {}]  }
   0x1   :  { %10 = vsyncpa [#allocation3 + $0x1], 0 }
   0x2   :  { %11 = vsyncpa [#allocation6], 0 }
   0x3   :  { %12 = vsyncpa [#allocation4], 0 }
   0x4   :  { %14 = vsyncpa [#allocation4 + $0x1], 0  ;;  %s969_s12 = smov 0   ;;  %s971_s13 = smov 0  }
   0x5   :  { %s973_s14 = smov 0   ;;  %s975_s15 = smov 0  }
   0x6 LB: > { %s990_s16 = sadd.s32 4294967295, %s940_s15   ;;  %s544_s17 = sadd.s32 4294967294, %s940_s15   ;;  %s940_s15 = sphi %s975_s15, %s1214_s15   ;;  %s936_s14 = sphi %s973_s14, %s1213_s14   ;;  %s932_s13 = sphi %s971_s13, %s1212_s13   ;;  %s928_s12 = sphi %s969_s12, %s1211_s12  }
   0x7   : > { %p40_p0 = scmp.ne.s32.totalorder %s932_s13, %s928_s12  ;;  %p1196_p1 = scmp.eq.s32.totalorder %s990_s16, 0 }
   0x8   : > { %p112_p3 = scmp.eq.s32.totalorder %s544_s17, 3  ;;  %p545_p5 = scmp.ge.s32.totalorder %s940_s15, 1 }
   0x9   : > { %p999_p4 = por %p1196_p1, %p40_p0  ;;  %p119_p7 = scmp.lt.s32.totalorder %s940_s15, 5 }
   0xa   : > { %p1004_p6 = por %p112_p3, %p40_p0  ;;  %s942_s21 = smov [#allocation5]  }
   0xb   : > { %s1199_s18 = scalar_select %p999_p4, 1, 0 }
   0xc   : > { %s1200_s19 = scalar_select %p1004_p6, 1, 0 }
   0xd   : > { %p1009_p8 = pnand %p545_p5, %p119_p7  ;;  %s134_s22 = sshll.u32 %s942_s21, 4  ;;  %s135_s22 = int_to_ptr.vmem [resolvable:$true] %s134_s22 }
   0xe   : > { %s1022_s24 = sadd.s32 1, %s940_s15   ;;  %s27_s25 = sadd.s32 1, %s936_s14 }
   0xf   : > { %s1201_s20 = scalar_select %p1009_p8, 1, 0 }
  0x10   : > { %p751_p9 = pneg %p1009_p8  ;;  %s24_s26 = ssub.s32 %s940_s15, %s1022_s24 }
  0x11   : > { %s812_s29 = scalar_lea.hbm %s1194_s2, 2048 }
  0x12   : > { %p1017_p10 = pnand %p751_p9, %p1196_p1  ;;  %p813_p11 = scmp.ne.s32.totalorder %s1194_s2, %s812_s29 }
  0x13   : > { %p819_p3 = scmp.lt.u32.totalorder %s812_s29, %s1194_s2 }
  0x14   : > { %p814_p12 = pneg %p1017_p10 }
  0x16   : > { %p815_p13 = pnand %p814_p12, %p813_p11 }
  0x18   : > { %p816_p0 = pneg %p815_p13 }
  0x1a   : > { %p821_p5 = pnand %p819_p3, %p816_p0 }
  0x1c   : > { %824 = shalt.err (!%p821_p5)
}
  0x1d   : > { %s825_s7 = scalar_lea.vmem %s135_s22, 2048  ;;  %p833_p2 = scmp.lt.s32.totalorder %s135_s22, %s135_s22 }
  0x1e   : > { %p826_p7 = scmp.ne.s32.totalorder %s135_s22, %s825_s7  ;;  %p834_p6 = scmp.lt.s32.totalorder %s825_s7, %s825_s7 }
  0x20   : > { %p828_p9 = pnand %p826_p7, %p814_p12  ;;  %p835_p4 = por %p834_p6, %p833_p2 }
  0x22   : > { %p829_p1 = pneg %p828_p9 }
  0x24   : > { %p836_p8 = pnand %p835_p4, %p829_p1 }
  0x26   : > { %839 = shalt.err (!%p836_p8)
}
  0x27   : > { %s943_s8 = smov 128   ;;  %s944_s9 = smov 8  }
  0x28   : > { %754 = dma.hbm_to_vmem [thread:$0]  (!%p1017_p10), %s1194_s2, 2048, %s135_s22, [#allocation6], %s943_s8, %s943_s8, %s944_s9  }
  0x29   : > { %p25_p1 = scmp.eq.s32.totalorder %s24_s26, 0  ;;  %p34_p2 = scmp.ne.s32.totalorder %s936_s14, %s932_s13 }
  0x2a   : > { %p35_p4 = scmp.eq.s32.totalorder %s940_s15, 0  ;;  %p764_p6 = scmp.lt.s32.totalorder %s940_s15, 4 }
  0x2b   : > { %s1051_s17 = scalar_select %p25_p1, %s936_s14, %s27_s25  }
  0x2c   : > { %p36_p8 = por %p35_p4, %p34_p2  ;;  %p1203_p11 = scmp.eq.s32.totalorder %s990_s16, 3 }
  0x2d   : > { %s148_s23 = sand.u32 1, %s936_s14   ;;  %s561_s27 = sshll.u32 %s940_s15, 9 }
  0x2e   : > { %p1055_p12 = por %p1203_p11, %p34_p2  ;;  %s548_s28 = sshll.u32 %s148_s23, 5 }
  0x2f   : > { %s1064_s4 = scalar_lea.hbm %s1192_s0, %s561_s27  ;;  %s152_s22 = scalar_lea.vmem [#allocation2], %s548_s28 }
  0x30   : > { %s159_s25 = sshll.u32 %s152_s22, 4  ;;  %p1066_p10 = pnand %p764_p6, %p36_p8  ;;  %s1070_s25 = int_to_ptr.vmem [resolvable:$true] %s159_s25 }
  0x31   : > { %s1072_s5 = scalar_lea.sflag [#allocation3], %s148_s23  ;;  %s840_s6 = scalar_lea.hbm %s1064_s4, 512 }
  0x32   : > { %p841_p13 = scmp.ne.s32.totalorder %s1064_s4, %s840_s6  ;;  %p842_p0 = pneg %p1066_p10 }
  0x33   : > { %s845_s11 = scalar_lea.hbm %s1192_s0, 2048  ;;  %p846_p7 = scmp.lt.u32.totalorder %s1064_s4, %s1192_s0 }
  0x34   : > { %p843_p3 = pnand %p842_p0, %p841_p13  ;;  %p847_p9 = scmp.lt.u32.totalorder %s845_s11, %s840_s6 }
  0x35   : > { %p849_p2 = scmp.lt.u32.totalorder %s840_s6, %s1064_s4 }
  0x36   : > { %p844_p5 = pneg %p843_p3  ;;  %p848_p1 = por %p847_p9, %p846_p7 }
  0x38   : > { %p850_p4 = por %p849_p2, %p848_p1 }
  0x3a   : > { %p851_p6 = pnand %p850_p4, %p844_p5 }
  0x3c   : > { %854 = shalt.err (!%p851_p6)
}
  0x3d   : > { %s855_s23 = scalar_lea.vmem %s1070_s25, 512  ;;  %s945_s29 = smov [#allocation2]  }
  0x3e   : > { %p856_p8 = scmp.ne.s32.totalorder %s1070_s25, %s855_s23  ;;  %s860_s30 = sshll.u32 %s945_s29, 4  ;;  %s861_s30 = int_to_ptr.vmem [resolvable:$false] %s860_s30 }
  0x3f   : > { %s862_s22 = scalar_lea.vmem %s861_s30, 1024  ;;  %p863_p3 = scmp.lt.s32.totalorder %s1070_s25, %s861_s30 }
  0x40   : > { %p858_p11 = pnand %p856_p8, %p842_p0  ;;  %p864_p7 = scmp.lt.s32.totalorder %s862_s22, %s855_s23 }
  0x42   : > { %p859_p13 = pneg %p858_p11  ;;  %p865_p9 = por %p864_p7, %p863_p3 }
  0x44   : > { %p866_p1 = pnand %p865_p9, %p859_p13 }
  0x46   : > { %869 = shalt.err (!%p866_p1)
}
  0x47   : > { %758 = dma.hbm_to_vmem [thread:$0]  (!%p1066_p10), %s1064_s4, 512, %s1070_s25, %s1072_s5, %s943_s8, %s943_s8, %s944_s9  }
  0x48   : > { %p1206_p0 = scmp.ne.s32.totalorder %s1201_s20, 0 }
  0x49   : > { %s1106_s6 = sand.u32 (!%p1206_p0), 1, %s932_s13   ;;  %p1207_p5 = scmp.ne.s32.totalorder (!%p1206_p0), %s1199_s18, 0 }
  0x4a   : > { %171 = sbr.rel (%p1206_p0) target bundleno = 377 (0x179), region = 32  ;;  %s552_s7 = sshll.u32 (!%p1206_p0), %s1106_s6, 5 }
  0x4b   : > { %s174_s10 = scalar_lea.sflag (!%p1206_p0), [#allocation3], %s1106_s6  ;;  %s1112_s26 = scalar_lea.vmem (!%p1206_p0), [#allocation2], %s552_s7 }
  0x51   : > { %915 = dma.done.wait (%p1207_p5), %s174_s10, 512  }
  0x52   : > { %917 = vsyncadd (%p1207_p5), %s174_s10, 4294966784  ;;  %p1208_p10 = scmp.eq.s32.totalorder %s990_s16, 0 }
  0x54   : > { %919 = dma.done.wait (%p1208_p10), [#allocation6], 2048   ;;  %p1209_p2 = pmov %p1208_p10 }
  0x55   : > { %v210_v0 = vld [vmem:[#allocation5] sm:$0xff]  ;;  %v211_v1 = vld [vmem:[#allocation5 + $0x8] sm:$0xff]  ;;  %v212_v2 = vld [vmem:[#allocation5 + $0x10] sm:$0xff]  ;;  %s562_s8 = sshll.u32 %s990_s16, 9  ;;  %s203_s9 = scalar_lea.vmem [#allocation7], %s552_s7 }
  0x56   : > { %921 = vsyncadd (%p1209_p2), [#allocation6], 4294965248  ;;  %v679_v3 = vpack.c.bf16 %v211_v1, %v210_v0  ;;  %v213_v4 = vld [vmem:[#allocation5 + $0x18] sm:$0xff]  ;;  %v214_v6 = vld [vmem:[#allocation5 + $0x20] sm:$0xff]  ;;  %s461_s4 = sshll.u32 %s203_s9, 4  ;;  %s1147_s11 = scalar_lea.hbm %s1195_s3, %s562_s8  ;;  %s1149_s4 = int_to_ptr.vmem [resolvable:$true] %s461_s4 }
  0x57   : > { %v683_v5 = vpack.c.bf16 %v213_v4, %v212_v2  ;;  %v215_v7 = vld [vmem:[#allocation5 + $0x28] sm:$0xff]  ;;  %v1123_v9 = vld [vmem:[%s1112_s26] sm:$0xff]  ;;  %v216_v10 = vld [vmem:[#allocation5 + $0x30] sm:$0xff]  ;;  %s448_s16 = scalar_lea.sflag [#allocation4], %s1106_s6  ;;  %s870_s27 = scalar_lea.vmem %s1149_s4, 512 }
  0x58   : > { %680 = vmatprep.subr.bf16.mxu0 %v679_v3  ;;  %712 = vmatprep.subr.bf16.mxu1 %v679_v3  ;;  %v687_v8 = vpack.c.bf16 %v215_v7, %v214_v6  ;;  %v217_v11 = vld [vmem:[#allocation5 + $0x38] sm:$0xff]  ;;  %v311_v12 = vmul.f32 %v1123_v9, %v1123_v9  ;;  %v218_v14 = vld [vmem:[#allocation5 + $0x40] sm:$0xff]  ;;  %v219_v15 = vld [vmem:[#allocation5 + $0x48] sm:$0xff]  ;;  %p871_p4 = scmp.ne.s32.totalorder %s1149_s4, %s870_s27  ;;  %s946_s28 = smov [#allocation7]  }
  0x59   : > { %682 = vmatpush3.bf16.msra.mxu0 %v679_v3  ;;  %714 = vmatpush3.bf16.msra.mxu1 %v679_v3  ;;  %v691_v13 = vpack.c.bf16 %v217_v11, %v216_v10  ;;  %v695_v16 = vpack.c.bf16 %v219_v15, %v218_v14  ;;  %v220_v17 = vld [vmem:[#allocation5 + $0x50] sm:$0xff]  ;;  %v221_v18 = vld [vmem:[#allocation5 + $0x58] sm:$0xff]  ;;  %v222_v20 = vld [vmem:[#allocation5 + $0x60] sm:$0xff]  ;;  %s874_s23 = sshll.u32 %s946_s28, 4  ;;  %s875_s23 = int_to_ptr.vmem [resolvable:$false] %s874_s23 }
  0x5a   : > { %684 = vmatprep.subr.bf16.mxu0 %v683_v5  ;;  %716 = vmatprep.subr.bf16.mxu1 %v683_v5  ;;  %v699_v19 = vpack.c.bf16 %v221_v18, %v220_v17  ;;  %v223_v21 = vld [vmem:[#allocation5 + $0x68] sm:$0xff]  ;;  %v224_v23 = vld [vmem:[#allocation5 + $0x70] sm:$0xff]  ;;  %v225_v24 = vld [vmem:[#allocation5 + $0x78] sm:$0xff]  ;;  %p872_p6 = pnand %p871_p4, %p1055_p12  ;;  %s876_s29 = scalar_lea.vmem %s875_s23, 1024 }
  0x5b   : > { %635 = vmatprep.mubr.f32.mxu0 %v1123_v9  ;;  %673 = vmatprep.mubr.f32.mxu1 %v311_v12  ;;  %v703_v22 = vpack.c.bf16 %v223_v21, %v222_v20  ;;  %v707_v25 = vpack.c.bf16 %v225_v24, %v224_v23  ;;  %v207_v26 = vld [vmem:[%s1112_s26 + $0x8] sm:$0xff]  ;;  %v1130_v27 = vld [vmem:[%s1112_s26 + $0x10] sm:$0xff]  ;;  %v209_v29 = vld [vmem:[%s1112_s26 + $0x18] sm:$0xff]  ;;  %p877_p11 = scmp.lt.s32.totalorder %s1149_s4, %s875_s23  ;;  %p878_p13 = scmp.lt.s32.totalorder %s876_s29, %s870_s27 }
  0x5c   : > { %v312_v28 = vmul.f32 %v207_v26, %v207_v26  ;;  %v313_v30 = vmul.f32 %v1130_v27, %v1130_v27  ;;  %v314_v31 = vmul.f32 %v209_v29, %v209_v29  ;;  %v555_v1 = vld [vmem:[%s1193_s1] ss:$0 sm:$0xff]  ;;  %p873_p8 = pneg %p872_p6 }
  0x5d   : > { %686 = vmatpush3.bf16.msra.mxu0 %v683_v5  ;;  %718 = vmatpush3.bf16.msra.mxu1 %v683_v5  ;;  %p879_p3 = por %p878_p13, %p877_p11 }
  0x5e   : > { %688 = vmatprep.subr.bf16.mxu0 %v687_v8  ;;  %720 = vmatprep.subr.bf16.mxu1 %v687_v8 }
  0x5f   : > { %p880_p7 = pnand %p879_p3, %p873_p8 }
  0x61   : > { %690 = vmatpush3.bf16.msra.mxu0 %v687_v8  ;;  %722 = vmatpush3.bf16.msra.mxu1 %v687_v8 }
  0x62   : > { %692 = vmatprep.subr.bf16.mxu0 %v691_v13  ;;  %724 = vmatprep.subr.bf16.mxu1 %v691_v13 }
  0x65   : > { %694 = vmatpush3.bf16.msra.mxu0 %v691_v13  ;;  %726 = vmatpush3.bf16.msra.mxu1 %v691_v13 }
  0x66   : > { %696 = vmatprep.subr.bf16.mxu0 %v695_v16  ;;  %728 = vmatprep.subr.bf16.mxu1 %v695_v16 }
  0x69   : > { %698 = vmatpush3.bf16.msra.mxu0 %v695_v16  ;;  %730 = vmatpush3.bf16.msra.mxu1 %v695_v16 }
  0x6a   : > { %700 = vmatprep.subr.bf16.mxu0 %v699_v19  ;;  %732 = vmatprep.subr.bf16.mxu1 %v699_v19 }
  0x6d   : > { %702 = vmatpush3.bf16.msra.mxu0 %v699_v19  ;;  %734 = vmatpush3.bf16.msra.mxu1 %v699_v19 }
  0x6e   : > { %704 = vmatprep.subr.bf16.mxu0 %v703_v22  ;;  %736 = vmatprep.subr.bf16.mxu1 %v703_v22 }
  0x71   : > { %706 = vmatpush3.bf16.msra.mxu0 %v703_v22  ;;  %738 = vmatpush3.bf16.msra.mxu1 %v703_v22 }
  0x72   : > { %708 = vmatprep.subr.bf16.mxu0 %v707_v25  ;;  %740 = vmatprep.subr.bf16.mxu1 %v707_v25 }
  0x75   : > { %710 = vmatpush3.bf16.msra.mxu0 %v707_v25  ;;  %742 = vmatpush3.bf16.msra.mxu1 %v707_v25 }
  0x78   : > { %636 = vmatmul.mubr.f32.vlgmr.msra.gmra.mrb[0].mxu0 %v207_v26  ;;  %674 = vmatmul.mubr.f32.vlgmr.msra.gmra.mrb[0].mxu1 %v312_v28 }
  0x79   : > { %638 = vmatprep.mubr.f32.mxu0 %v1130_v27  ;;  %676 = vmatprep.mubr.f32.mxu1 %v313_v30 }
  0x7c   : > { %639 = vmatmul.mubr.f32.gmra.mrb[2].mxu0 %v209_v29  ;;  %677 = vmatmul.mubr.f32.gmra.mrb[2].mxu1 %v314_v31 }
 0x14b   : > { %v637_v32 = vpop.f32.mrb[0].mxu0  ;;  %v675_v33 = vpop.f32.mrb[0].mxu1 }
 0x14c   : > { %v401_v34 = vmul.f32 0.03125, %v637_v32  ;;  %v292_v35 = vpop.f32.mrb[1].mxu0  ;;  %v405_v36 = vmul.f32 0.03125, %v675_v33  ;;  %v381_v37 = vpop.f32.mrb[1].mxu1 }
 0x14d   : > { %v400_v38 = vmul.f32 0.03125, %v292_v35  ;;  %v404_v39 = vmul.f32 0.03125, %v381_v37 }
 0x14e   : > { %v409_v40 = vmul.f32 %v401_v34, %v401_v34 }
 0x14f   : > { %v408_v41 = vmul.f32 %v400_v38, %v400_v38  ;;  %v640_v42 = vpop.f32.mrb[2].mxu0  ;;  %v678_v43 = vpop.f32.mrb[2].mxu1 }
 0x150   : > { %v413_v44 = vsub.f32 %v405_v36, %v409_v40  ;;  %v403_v45 = vmul.f32 0.03125, %v640_v42  ;;  %v302_v46 = vpop.f32.mrb[3].mxu0  ;;  %v407_v47 = vmul.f32 0.03125, %v678_v43  ;;  %v391_v48 = vpop.f32.mrb[3].mxu1 }
 0x151   : > { %v412_v49 = vsub.f32 %v404_v39, %v408_v41  ;;  %v402_v50 = vmul.f32 0.03125, %v302_v46  ;;  %v406_v51 = vmul.f32 0.03125, %v391_v48 }
 0x152   : > { %v417_v52 = vmax.f32 %v413_v44, 0.0  ;;  %v411_v53 = vmul.f32 %v403_v45, %v403_v45 }
 0x153   : > { %v416_v54 = vmax.f32 %v412_v49, 0.0  ;;  %v410_v55 = vmul.f32 %v402_v50, %v402_v50 }
 0x154   : > { %v421_v56 = vadd.f32 1e-05, %v417_v52  ;;  %v415_v57 = vsub.f32 %v407_v47, %v411_v53 }
 0x155   : > { %v420_v58 = vadd.f32 1e-05, %v416_v54  ;;  %v414_v59 = vsub.f32 %v406_v51, %v410_v55 }
 0x156   : > { %804 = vrsqrt.f32 %v421_v56  ;;  %v419_v60 = vmax.f32 %v415_v57, 0.0 }
 0x157   : > { %806 = vrsqrt.f32 %v420_v58  ;;  %v418_v61 = vmax.f32 %v414_v59, 0.0 }
 0x158   : > { %v423_v62 = vadd.f32 1e-05, %v419_v60 }
 0x159   : > { %v422_v63 = vadd.f32 1e-05, %v418_v61 }
 0x15a   : > { %808 = vrsqrt.f32 %v423_v62 }
 0x15b   : > { %810 = vrsqrt.f32 %v422_v63 }
 0x160   : > { %v805_v0 = vpop.eup %804 }
 0x161   : > { %v807_v2 = vpop.eup %806  ;;  %v429_v3 = vmul.f32 %v805_v0, %v207_v26 }
 0x162   : > { %v428_v4 = vmul.f32 %v807_v2, %v1123_v9 }
 0x163   : > { %v440_v5 = vmul.f32 %v555_v1, %v429_v3 }
 0x164   : > { %v809_v6 = vpop.eup %808  ;;  %v439_v7 = vmul.f32 %v555_v1, %v428_v4 }
 0x165   : > { %v811_v8 = vpop.eup %810  ;;  %444 = vst [vmem:[%s203_s9 + $0x8] sm:$0xff] %v440_v5  ;;  %v431_v10 = vmul.f32 %v809_v6, %v209_v29 }
 0x166   : > { %443 = vst [vmem:[%s203_s9] sm:$0xff] %v439_v7  ;;  %v430_v11 = vmul.f32 %v811_v8, %v1130_v27 }
 0x167   : > { %v442_v12 = vmul.f32 %v555_v1, %v431_v10 }
 0x168   : > { %v441_v9 = vmul.f32 %v555_v1, %v430_v11 }
 0x169   : > { %446 = vst [vmem:[%s203_s9 + $0x18] sm:$0xff] %v442_v12 }
 0x16a   : > { %445 = vst [vmem:[%s203_s9 + $0x10] sm:$0xff] %v441_v9 }
 0x16b   : > { %883 = shalt.err (!%p880_p7)
}
 0x16c   : > { %s884_s30 = scalar_lea.hbm %s1147_s11, 512  ;;  %s888_s10 = scalar_lea.hbm %s1195_s3, 2048 }
 0x16d   : > { %p885_p9 = scmp.ne.s32.totalorder %s1147_s11, %s884_s30  ;;  %p889_p5 = scmp.lt.u32.totalorder %s1147_s11, %s1195_s3 }
 0x16e   : > { %p890_p10 = scmp.lt.u32.totalorder %s888_s10, %s884_s30  ;;  %p892_p4 = scmp.lt.u32.totalorder %s884_s30, %s1147_s11 }
 0x16f   : > { %p886_p1 = pnand %p885_p9, %p1055_p12 }
 0x170   : > { %p891_p2 = por %p890_p10, %p889_p5 }
 0x171   : > { %p887_p0 = pneg %p886_p1 }
 0x172   : > { %p893_p6 = por %p892_p4, %p891_p2 }
 0x174   : > { %p894_p8 = pnand %p893_p6, %p887_p0 }
 0x176   : > { %897 = shalt.err (!%p894_p8)
}
 0x177   : > { %s947_s20 = smov 128   ;;  %s948_s8 = smov 8  }
 0x178   : > { %749 = dma.vmem_to_hbm [thread:$0]  (%p1055_p12), %s1149_s4, 512, %s1147_s11, %s448_s16, %s947_s20, %s947_s20, %s948_s8  }
 0x179 PF: > { %p766_p11 = scmp.ge.s32.totalorder %s940_s15, 2  ;;  %s476_s9 = sand.u32 1, %s928_s12  }
 0x17a   : > { %p1210_p13 = scmp.ne.s32.totalorder %s1200_s19, 0  ;;  %s477_s25 = scalar_lea.sflag [#allocation4], %s476_s9 }
 0x17c   : > { %p760_p3 = pnand %p766_p11, %p1210_p13 }
 0x17e   : > { %923 = dma.done.wait (!%p760_p3), %s477_s25, 512  }
 0x17f   : > { %925 = vsyncadd (!%p760_p3), %s477_s25, 4294966784  ;;  %p17_p7 = scmp.ge.s32.totalorder %s1022_s24, 6   ;;  %s1211_s12 = smov %s932_s13 }
 0x180   : > { %s1212_s13 = smov %s936_s14  ;;  %s1213_s14 = smov %s1051_s17 }
 0x181   : > { %s1214_s15 = smov %s1022_s24  ;;  %19 = sbr.rel (!%p17_p7) target bundleno = 6 (0x6), region = 81 }
 0x188   :  { %482 = vsyncpa [#allocation3], 1 }
 0x189   :  { %484 = vsyncpa [#allocation3 + $0x1], 1 }
 0x18a   :  { %485 = vsyncpa [#allocation6], 1 }
 0x18b   :  { %486 = vsyncpa [#allocation4], 1 }
 0x18c   :  { %488 = vsyncpa [#allocation4 + $0x1], 1 }

</bundles_post_ra>
